<compile_context>
chip_gen: v7x
topology: tpu7x:2x2x1
jax: 0.10.0
libtpu: 0.0.40
codegen_flags: <defaults>
</compile_context>

<pallas_src>
import jax
import jax.numpy as jnp
from jax.experimental import pallas as pl
from jax.experimental.pallas import tpu as pltpu

LANE = 128        # vreg lane width
SUBLANE = 8       # f32 sublane tile
_MIN_SPLIT_ROWS = 512          # force >=2 grid steps above 2*this many rows
_VMEM_TILE_BUDGET = 20 << 20   # keep double-buffered tiles under ~20 MiB


def _round_up(x, m):
    return (x + m - 1) // m * m


def return_output(action):
    return action


# ----------------------------------------------------------------------------
# Pallas kernel: fused MLP policy forward over one row-tile
#   out = tanh(x @ W1 + b1) @ W2 + b2        (W2/b2 lane-padded to 128 cols)
# ----------------------------------------------------------------------------
def _policy_mlp_kernel(x_ref, w1_ref, b1_ref, w2_ref, b2_ref, out_ref):
    x = x_ref[...]
    # Hidden layer: MXU matmul with f32 accumulation; bias-add + tanh in f32
    # (keeps VPU/EUP math in f32 even when storage is bf16 — safe on v5e too).
    h = jnp.dot(x, w1_ref[...], preferred_element_type=jnp.float32)
    h = jnp.tanh(h + b1_ref[...].astype(jnp.float32))
    # Output layer (lane-padded to 128 columns -> full-lane store, no vst.msk).
    h = h.astype(w2_ref.dtype)
    o = jnp.dot(h, w2_ref[...], preferred_element_type=jnp.float32)
    o = o + b2_ref[...].astype(jnp.float32)
    out_ref[...] = o.astype(out_ref.dtype)


def policy_forward(x, w1, b1, w2p, b2p, *, act_dim, out_dtype=None,
                   block_rows=2048):
    """Fused policy-network forward as one Pallas call.

    x        : [batch, obs_dim]
    w1, b1   : [obs_dim, hidden], [1, hidden]
    w2p, b2p : [hidden, act_padded], [1, act_padded]  (act_padded % 128 == 0)

    The batch axis is padded to a multiple of the row tile and tiled over a
    1-D "parallel" grid; weights/biases are full resident VMEM blocks.
    Returns [batch, act_dim] (lane padding sliced off), dtype `out_dtype`.
    """
    batch, obs_dim = x.shape
    hidden = w1.shape[1]
    act_p = w2p.shape[1]
    dtype = w1.dtype
    out_dtype = dtype if out_dtype is None else out_dtype
    x = x.astype(dtype)

    in_bytes = jnp.dtype(dtype).itemsize
    out_bytes = jnp.dtype(out_dtype).itemsize

    # --- row tiling -----------------------------------------------------------
    batch_p = _round_up(max(batch, SUBLANE), SUBLANE)
    tm = min(block_rows, batch_p)

    # v7x has 2 TensorCores: make sure large batches produce >= 2 grid steps so
    # the "parallel" grid axis can be sharded across cores.
    if tm == batch_p and batch_p >= 2 * _MIN_SPLIT_ROWS:
        tm = _round_up((batch_p + 1) // 2, SUBLANE)

    # Clamp tile rows so double-buffered x/out tiles plus the f32 h temporary
    # stay well under the scoped-VMEM default (32 MiB, v7x has 64 MiB physical).
    per_row = obs_dim * in_bytes + act_p * out_bytes + hidden * 4
    max_rows = max(SUBLANE, (_VMEM_TILE_BUDGET // (2 * per_row)) // SUBLANE * SUBLANE)
    tm = min(tm, max_rows)

    batch_p = _round_up(batch_p, tm)
    if batch_p != batch:
        x = jnp.pad(x, ((0, batch_p - batch), (0, 0)))

    out = pl.pallas_call(
        _policy_mlp_kernel,
        out_shape=jax.ShapeDtypeStruct((batch_p, act_p), out_dtype),
        grid_spec=pltpu.PrefetchScalarGridSpec(
            num_scalar_prefetch=0,
            grid=(batch_p // tm,),
            in_specs=[
                pl.BlockSpec((tm, obs_dim), lambda i: (i, 0)),      # x row tile
                pl.BlockSpec((obs_dim, hidden), lambda i: (0, 0)),  # W1 resident
                pl.BlockSpec((1, hidden), lambda i: (0, 0)),        # b1 resident
                pl.BlockSpec((hidden, act_p), lambda i: (0, 0)),    # W2 resident
                pl.BlockSpec((1, act_p), lambda i: (0, 0)),         # b2 resident
            ],
            out_specs=pl.BlockSpec((tm, act_p), lambda i: (i, 0)),
        ),
        compiler_params=pltpu.CompilerParams(
            dimension_semantics=("parallel",)),
    )(x, w1, b1, w2p, b2p)

    # Strip batch padding and lane padding outside the kernel (cheap XLA slice).
    # NOTE: padded rows contain nonzero garbage until this slice — never reduce
    # over `out` before slicing.
    return out[:batch, :act_dim]


# ----------------------------------------------------------------------------
# Simple policy network holding deterministic parameters
# ----------------------------------------------------------------------------
class PolicyNetwork:
    def __init__(self, obs_dim, hidden_dim, act_dim, key,
                 dtype=jnp.float32, out_dtype=None, block_rows=2048):
        k1, k2 = jax.random.split(key, 2)
        self.obs_dim, self.hidden_dim, self.act_dim = obs_dim, hidden_dim, act_dim
        self.dtype = dtype
        self.out_dtype = dtype if out_dtype is None else out_dtype
        self.block_rows = block_rows

        scale1 = 1.0 / jnp.sqrt(obs_dim)
        scale2 = 1.0 / jnp.sqrt(hidden_dim)
        w1 = jax.random.normal(k1, (obs_dim, hidden_dim), jnp.float32) * scale1
        b1 = jnp.zeros((1, hidden_dim), jnp.float32)
        w2 = jax.random.normal(k2, (hidden_dim, act_dim), jnp.float32) * scale2
        b2 = jnp.zeros((1, act_dim), jnp.float32)

        # Lane-pad the output projection to a multiple of 128 so the kernel's
        # output store is full-lane (zero columns are sliced off afterwards).
        act_p = _round_up(act_dim, LANE)
        w2p = jnp.pad(w2, ((0, 0), (0, act_p - act_dim)))
        b2p = jnp.pad(b2, ((0, 0), (0, act_p - act_dim)))

        # Storage dtype: f32 by default.  bf16 halves HBM traffic on ALL chips
        # (v5e included — the kernel accumulates in f32 and does bias/tanh in
        # f32, so v5e's missing bf16 VPU/EUP path does not matter).
        self.w1 = w1.astype(dtype)
        self.b1 = b1.astype(dtype)
        self.w2 = w2p.astype(dtype)   # [hidden, act_padded]
        self.b2 = b2p.astype(dtype)   # [1, act_padded]

        # JIT the whole forward so per-step Python dispatch/tracing does not
        # dominate the ~1us kernel.
        self._jit_forward = jax.jit(self.forward_impl)

    def forward_impl(self, x):
        return policy_forward(x, self.w1, self.b1, self.w2, self.b2,
                              act_dim=self.act_dim, out_dtype=self.out_dtype,
                              block_rows=self.block_rows)

    def forward(self, x):
        return self._jit_forward(x)


# ----------------------------------------------------------------------------
# Agent wrapper (mirrors torch_rl/core.py Agent semantics)
# ----------------------------------------------------------------------------
class Agent:
    """Wrapper for neural networks for more convenient use in RL environments."""

    def __init__(self, policy_network, action_choice_function=return_output):
        self.policy_network = policy_network
        self.action_choice_function = action_choice_function
        self._jit_single = None     # obs -> row-0 logits (padding fused in jit)
        self._jit_choose = None     # obs -> (row-0 logits, chosen action)
        print('Agent initialized...')

    def forward(self, x):
        out = self.policy_network.forward(x)
        return out

    # ---- helpers ------------------------------------------------------------
    def _stack_single(self, args):
        if len(args) > 1:
            return jnp.concatenate(
                [jnp.asarray(a, jnp.float32).reshape(-1) for a in args], axis=-1)
        return jnp.asarray(args[0], jnp.float32).reshape(-1)

    def _ensure_action_fns(self):
        if self._jit_single is not None:
            return
        pol_fwd = getattr(self.policy_network, "forward_impl",
                          self.policy_network.forward)
        choice = self.action_choice_function

        def _single(obs):
            # Pad the single sample to a full 8-row f32 sublane tile so the
            # batched kernel is reused; padding + slice live inside the jit.
            xb = jnp.pad(obs[None, :], ((0, SUBLANE - 1), (0, 0)))
            return pol_fwd(xb)[0]

        def _single_choose(obs):
            raw = _single(obs)
            return raw, choice(raw)

        self._jit_single = jax.jit(_single)
        self._jit_choose = jax.jit(_single_choose)

    # ---- API ----------------------------------------------------------------
    def action(self, *args):
        """Non-batch call: stack inputs along the feature axis, add batch dim."""
        x = self._stack_single(args)
        self._ensure_action_fns()
        out = self._jit_single(x)
        self.out = out
        return out

    def actions(self, *args):
        """Batch call: stack inputs along the feature axis."""
        if len(args) > 1:
            x = jnp.concatenate([jnp.asarray(a, jnp.float32) for a in args], axis=1)
        else:
            x = jnp.asarray(args[0], jnp.float32)
        out = self.forward(x)
        self.out = out
        return out

    def choose_action(self, *args):
        x = self._stack_single(args)
        self._ensure_action_fns()
        if self._jit_choose is not None:
            try:
                raw, act = self._jit_choose(x)
                self.out = raw
                return act
            except Exception:
                # action_choice_function not jittable: fall back to eager apply.
                self._jit_choose = None
        action = self.action(*args)
        return self.action_choice_function(action)


if __name__ == "__main__":
    key = jax.random.PRNGKey(0)
    k_net, k_x, k_big = jax.random.split(key, 3)

    # hidden is a multiple of 128 (full lane density); obs/act stay small.
    batch, obs_dim, hidden_dim, act_dim = 8, 32, 128, 8
    x = jax.random.normal(k_x, (batch, obs_dim), jnp.float32)

    # --- float32 policy: strict reference check -----------------------------
    policy = PolicyNetwork(obs_dim, hidden_dim, act_dim, k_net, dtype=jnp.float32)
    agent = Agent(policy)

    out = jax.block_until_ready(agent.forward(x))
    assert out.shape == (batch, act_dim)

    ref = (jnp.tanh(x @ policy.w1 + policy.b1)
           @ policy.w2[:, :act_dim] + policy.b2[:, :act_dim])
    assert jnp.allclose(out, ref, atol=1e-4, rtol=1e-4)

    # Non-batch `action` / `choose_action` path: padding, kernel, row-0 slice,
    # and the (identity) action-choice function all run inside one jit.
    single = jax.block_until_ready(agent.choose_action(x[0]))
    assert single.shape == (act_dim,)
    assert jnp.allclose(single, ref[0], atol=1e-4, rtol=1e-4)

    # --- larger batch: multi-step "parallel" grid + batch padding ------------
    xb = jax.random.normal(k_big, (1543, obs_dim), jnp.float32)
    outb = jax.block_until_ready(agent.forward(xb))
    refb = (jnp.tanh(xb @ policy.w1 + policy.b1)
            @ policy.w2[:, :act_dim] + policy.b2[:, :act_dim])
    assert outb.shape == (1543, act_dim)
    assert jnp.allclose(outb, refb, atol=1e-4, rtol=1e-4)

    # --- f32 weights + bf16 output (halved HBM writeback, mem-bound win) -----
    policy_mixed = PolicyNetwork(obs_dim, hidden_dim, act_dim, k_net,
                                 dtype=jnp.float32, out_dtype=jnp.bfloat16)
    out_mixed = jax.block_until_ready(Agent(policy_mixed).forward(x))
    assert out_mixed.dtype == jnp.bfloat16
    assert jnp.allclose(out_mixed.astype(jnp.float32), ref, atol=2e-2, rtol=2e-2)

    # --- bf16 storage variant (valid on v5e/v6e/v7x, f32 accumulation) -------
    policy_bf16 = PolicyNetwork(obs_dim, hidden_dim, act_dim, k_net,
                                dtype=jnp.bfloat16)
    agent_bf16 = Agent(policy_bf16)
    out_bf16 = jax.block_until_ready(agent_bf16.forward(x))
    assert out_bf16.shape == (batch, act_dim)

    ref_bf16 = (jnp.tanh(x.astype(jnp.bfloat16).astype(jnp.float32)
                         @ policy_bf16.w1.astype(jnp.float32)
                         + policy_bf16.b1.astype(jnp.float32))
                @ policy_bf16.w2[:, :act_dim].astype(jnp.float32)
                + policy_bf16.b2[:, :act_dim].astype(jnp.float32))
    assert jnp.allclose(out_bf16.astype(jnp.float32), ref_bf16,
                        atol=5e-2, rtol=5e-2)

    print("KERNEL_OK")
</pallas_src>

<mosaic_0001>
module attributes {stable_mosaic.version = 11 : i64} {
  func.func @_policy_mlp_kernel(%arg0: i32, %arg1: memref<8x32xf32, #tpu.memory_space<vmem>>, %arg2: memref<32x128xf32, #tpu.memory_space<vmem>>, %arg3: memref<1x128xf32, #tpu.memory_space<vmem>>, %arg4: memref<128x128xf32, #tpu.memory_space<vmem>>, %arg5: memref<1x128xf32, #tpu.memory_space<vmem>>, %arg6: memref<8x128xf32, #tpu.memory_space<vmem>>) attributes {dimension_semantics = [#tpu.dimension_semantics<parallel>], iteration_bounds = array<i64: 1>, scalar_prefetch = 0 : i64, scratch_operands = 0 : i64, tpu.core_type = #tpu.core_type<tc>, window_params = [{transform_indices = @transform_0, window_bounds = array<i64: 8, 32>}, {pipeline_mode = #tpu.pipeline_mode<synchronous>, transform_indices = @transform_1, window_bounds = array<i64: 32, 128>}, {pipeline_mode = #tpu.pipeline_mode<synchronous>, transform_indices = @transform_2, window_bounds = array<i64: 1, 128>}, {pipeline_mode = #tpu.pipeline_mode<synchronous>, transform_indices = @transform_3, window_bounds = array<i64: 128, 128>}, {pipeline_mode = #tpu.pipeline_mode<synchronous>, transform_indices = @transform_4, window_bounds = array<i64: 1, 128>}, {transform_indices = @transform_5, window_bounds = array<i64: 8, 128>}]} {
    %c0 = arith.constant 0 : index
    %c0_0 = arith.constant 0 : index
    %0 = vector.load %arg1[%c0, %c0_0] : memref<8x32xf32, #tpu.memory_space<vmem>>, vector<8x32xf32>
    %c0_1 = arith.constant 0 : index
    %c0_2 = arith.constant 0 : index
    %1 = vector.load %arg2[%c0_1, %c0_2] : memref<32x128xf32, #tpu.memory_space<vmem>>, vector<32x128xf32>
    %cst = arith.constant dense<0.000000e+00> : vector<8x128xf32>
    %2 = tpu.matmul %0, %1, %cst {dimension_numbers = #tpu.dot_dimension_numbers<[1], [0], [0], [1], [0, 0, 1, 1], [], []>} : vector<8x32xf32>, vector<32x128xf32>, vector<8x128xf32> -> vector<8x128xf32>
    %c0_3 = arith.constant 0 : index
    %c0_4 = arith.constant 0 : index
    %3 = vector.load %arg3[%c0_3, %c0_4] : memref<1x128xf32, #tpu.memory_space<vmem>>, vector<1x128xf32>
    %4 = vector.broadcast %3 : vector<1x128xf32> to vector<8x128xf32>
    %5 = arith.addf %2, %4 : vector<8x128xf32>
    %6 = math.tanh %5 : vector<8x128xf32>
    %c0_5 = arith.constant 0 : index
    %c0_6 = arith.constant 0 : index
    %7 = vector.load %arg4[%c0_5, %c0_6] : memref<128x128xf32, #tpu.memory_space<vmem>>, vector<128x128xf32>
    %cst_7 = arith.constant dense<0.000000e+00> : vector<8x128xf32>
    %8 = tpu.matmul %6, %7, %cst_7 {dimension_numbers = #tpu.dot_dimension_numbers<[1], [0], [0], [1], [0, 0, 1, 1], [], []>} : vector<8x128xf32>, vector<128x128xf32>, vector<8x128xf32> -> vector<8x128xf32>
    %c0_8 = arith.constant 0 : index
    %c0_9 = arith.constant 0 : index
    %9 = vector.load %arg5[%c0_8, %c0_9] : memref<1x128xf32, #tpu.memory_space<vmem>>, vector<1x128xf32>
    %10 = vector.broadcast %9 : vector<1x128xf32> to vector<8x128xf32>
    %11 = arith.addf %8, %10 : vector<8x128xf32>
    %c0_10 = arith.constant 0 : index
    %c0_11 = arith.constant 0 : index
    %12 = vector.load %arg6[%c0_10, %c0_11] : memref<8x128xf32, #tpu.memory_space<vmem>>, vector<8x128xf32>
    tpu.vector_store %arg6[%c0_10, %c0_11], %11 {strides = array<i32>} : memref<8x128xf32, #tpu.memory_space<vmem>>, vector<8x128xf32>,
    return
  }
  func.func @transform_0(%arg0: i32) -> (i32, i32) {
    %c0_i32 = arith.constant 0 : i32
    %c0_i32_0 = arith.constant 0 : i32
    return %arg0, %c0_i32 : i32, i32
  }
  func.func @transform_1(%arg0: i32) -> (i32, i32) {
    %c0_i32 = arith.constant 0 : i32
    %c0_i32_0 = arith.constant 0 : i32
    %c0_i32_1 = arith.constant 0 : i32
    return %c0_i32, %c0_i32_0 : i32, i32
  }
  func.func @transform_2(%arg0: i32) -> (i32, i32) {
    %c0_i32 = arith.constant 0 : i32
    %c0_i32_0 = arith.constant 0 : i32
    %c0_i32_1 = arith.constant 0 : i32
    return %c0_i32, %c0_i32_0 : i32, i32
  }
  func.func @transform_3(%arg0: i32) -> (i32, i32) {
    %c0_i32 = arith.constant 0 : i32
    %c0_i32_0 = arith.constant 0 : i32
    %c0_i32_1 = arith.constant 0 : i32
    return %c0_i32, %c0_i32_0 : i32, i32
  }
  func.func @transform_4(%arg0: i32) -> (i32, i32) {
    %c0_i32 = arith.constant 0 : i32
    %c0_i32_0 = arith.constant 0 : i32
    %c0_i32_1 = arith.constant 0 : i32
    return %c0_i32, %c0_i32_0 : i32, i32
  }
  func.func @transform_5(%arg0: i32) -> (i32, i32) {
    %c0_i32 = arith.constant 0 : i32
    %c0_i32_0 = arith.constant 0 : i32
    return %arg0, %c0_i32 : i32, i32
  }
}

</mosaic_0001>

<bundles_post_ra>
// kernel: forward_impl.1
= control target key start
LH: loop header
LB: loop body
LE: loop exit
PB: predicated region body
PF: predicated region fallthrough
CT: control target
= control target key end

     0   :  { %10 = vsyncpa [#allocation3], 0  ;;  %s562_s0 = inlined_call_operand.hbm [shape: f32[8,32], index: 0, kind: input, shape index: {}]   ;;  %s563_s1 = inlined_call_operand.hbm [shape: f32[32,128], index: 1, kind: input, shape index: {}]   ;;  %s564_s2 = inlined_call_operand.vmem [shape: f32[1,128], index: 2, kind: input, shape index: {}, may-alias: {2,4}]   ;;  %s565_s3 = inlined_call_operand.hbm [shape: f32[128,128], index: 3, kind: input, shape index: {}]   ;;  %s566_s4 = inlined_call_operand.vmem [shape: f32[1,128], index: 4, kind: input, shape index: {}, may-alias: {2,4}]   ;;  %s567_s5 = inlined_call_operand.hbm [shape: f32[8,128], index: 5, kind: output, shape index: {}]  }
   0x1   :  { %11 = vsyncpa [#allocation6], 0 }
   0x2   :  { %12 = vsyncpa [#allocation4], 0  ;;  %s463_s18 = smov [#allocation5]   ;;  %s369_s22 = scalar_lea.hbm %s563_s1, 512 }
   0x3   :  { %s28_s19 = sshll.u32 %s463_s18, 4  ;;  %p370_p0 = scmp.ne.s32.totalorder %s563_s1, %s369_s22  ;;  %s29_s19 = int_to_ptr.vmem [resolvable:$true] %s28_s19 }
   0x4   :  { %p373_p1 = scmp.lt.u32.totalorder %s369_s22, %s563_s1 }
   0x6   :  { %p375_p2 = pnand %p373_p1, %p370_p0 }
   0x8   :  { %378 = shalt.err (!%p375_p2)
}
   0x9   :  { %s379_s27 = scalar_lea.vmem %s29_s19, 512  ;;  %p384_p4 = scmp.lt.s32.totalorder %s29_s19, %s29_s19 }
   0xa   :  { %p380_p3 = scmp.ne.s32.totalorder %s29_s19, %s379_s27  ;;  %p385_p5 = scmp.lt.s32.totalorder %s379_s27, %s379_s27 }
   0xc   :  { %p386_p6 = por %p385_p5, %p384_p4 }
   0xe   :  { %p387_p7 = pnand %p386_p6, %p380_p3 }
  0x10   :  { %390 = shalt.err (!%p387_p7)
}
  0x11   :  { %s464_s28 = smov 128   ;;  %s465_s29 = smov 8  }
  0x12   :  { %34 = dma.hbm_to_vmem [thread:$0]  %s563_s1, 512, %s29_s19, [#allocation6], %s464_s28, %s464_s28, %s465_s29  }
  0x13   :  { %s466_s7 = smov [#allocation2]   ;;  %s467_s9 = smov [#allocation7]  }
  0x14   :  { %s19_s8 = sshll.u32 %s466_s7, 4  ;;  %s42_s10 = sshll.u32 %s467_s9, 4  ;;  %s20_s8 = int_to_ptr.vmem [resolvable:$true] %s19_s8  ;;  %s43_s10 = int_to_ptr.vmem [resolvable:$true] %s42_s10 }
  0x15   :  { %s391_s13 = scalar_lea.hbm %s562_s0, 128 }
  0x16   :  { %p392_p8 = scmp.ne.s32.totalorder %s562_s0, %s391_s13  ;;  %p395_p9 = scmp.lt.u32.totalorder %s391_s13, %s562_s0 }
  0x18   :  { %p397_p10 = pnand %p395_p9, %p392_p8 }
  0x1a   :  { %400 = shalt.err (!%p397_p10)
}
  0x1b   :  { %s401_s1 = scalar_lea.vmem %s20_s8, 128  ;;  %p406_p12 = scmp.lt.s32.totalorder %s20_s8, %s20_s8 }
  0x1c   :  { %p402_p11 = scmp.ne.s32.totalorder %s20_s8, %s401_s1  ;;  %p407_p13 = scmp.lt.s32.totalorder %s401_s1, %s401_s1 }
  0x1e   :  { %p408_p0 = por %p407_p13, %p406_p12 }
  0x20   :  { %p409_p1 = pnand %p408_p0, %p402_p11 }
  0x22   :  { %412 = shalt.err (!%p409_p1)
}
  0x23   :  { %22 = dma.hbm_to_vmem [thread:$0]  %s562_s0, 128, %s20_s8, [#allocation3]  }
  0x24   :  { %s413_s22 = scalar_lea.hbm %s565_s3, 2048 }
  0x25   :  { %p414_p2 = scmp.ne.s32.totalorder %s565_s3, %s413_s22  ;;  %p417_p3 = scmp.lt.u32.totalorder %s413_s22, %s565_s3 }
  0x27   :  { %p419_p4 = pnand %p417_p3, %p414_p2 }
  0x29   :  { %422 = shalt.err (!%p419_p4)
}
  0x2a   :  { %s423_s27 = scalar_lea.vmem %s43_s10, 2048  ;;  %p428_p6 = scmp.lt.s32.totalorder %s43_s10, %s43_s10 }
  0x2b   :  { %p424_p5 = scmp.ne.s32.totalorder %s43_s10, %s423_s27  ;;  %p429_p7 = scmp.lt.s32.totalorder %s423_s27, %s423_s27 }
  0x2d   :  { %p430_p8 = por %p429_p7, %p428_p6 }
  0x2f   :  { %p431_p9 = pnand %p430_p8, %p424_p5 }
  0x31   :  { %434 = shalt.err (!%p431_p9)
}
  0x32   :  { %48 = dma.hbm_to_vmem [thread:$0]  %s565_s3, 2048, %s43_s10, [#allocation6], %s464_s28, %s464_s28, %s465_s29  }
  0x33   :  { %457 = dma.done.wait [#allocation3], 128  }
  0x34   :  { %458 = vsyncadd [#allocation3], 4294967168 }
  0x35   :  { %459 = dma.done.wait [#allocation6], 2560  }
  0x36   :  { %460 = vsyncadd [#allocation6], 4294964736  ;;  %v468_v0 = vmov 0.0|0.0   ;;  %vm469_vm0 = vmmov 0   ;;  %v470_v1 = vmov 0.0   ;;  %v61_v2 = vld [vmem:[#allocation5] sm:$0xff] }
  0x37   :  { %328 = vmatprep.subr.bf16.mxu0 %v468_v0  ;;  %290 = vmatprep.mubr.msk.f32.mxu0 %vm469_vm0, %v470_v1  ;;  %v62_v3 = vld [vmem:[#allocation5 + $0x8] sm:$0xff]  ;;  %v63_v4 = vld [vmem:[#allocation5 + $0x10] sm:$0xff]  ;;  %v64_v6 = vld [vmem:[#allocation5 + $0x18] sm:$0xff]  ;;  %vm72_vm1 = vcmask 261120   ;;  %s471_s7 = smov [#allocation8]  }
  0x38   :  { %334 = vmatprep.subr.bf16.mxu1 %v468_v0  ;;  %325 = vmatprep.mubr.msk.f32.mxu1 %vm469_vm0, %v470_v1  ;;  %v329_v5 = vpack.c.bf16 %v62_v3, %v61_v2  ;;  %v147_v7 = vld [vmem:[#allocation7] sm:$0xff]  ;;  %v148_v8 = vld [vmem:[#allocation7 + $0x8] sm:$0xff]  ;;  %v149_v9 = vld [vmem:[#allocation7 + $0x10] sm:$0xff]  ;;  %v332_v11 = vpack.c.bf16 %v64_v6, %v63_v4  ;;  %s247_s8 = sshll.u32 %s471_s7, 4  ;;  %s248_s8 = int_to_ptr.vmem [resolvable:$true] %s247_s8 }
  0x39   :  { %v150_v10 = vld [vmem:[#allocation7 + $0x18] sm:$0xff]  ;;  %v335_v12 = vpack.c.bf16 %v148_v8, %v147_v7  ;;  %v151_v14 = vld [vmem:[#allocation7 + $0x20] sm:$0xff]  ;;  %v152_v15 = vld [vmem:[#allocation7 + $0x28] sm:$0xff]  ;;  %s435_s9 = scalar_lea.vmem %s248_s8, 128  ;;  %p440_p11 = scmp.lt.s32.totalorder %s248_s8, %s248_s8 }
  0x3a   :  { %330 = vmatpush3.bf16.msra.mxu0 %v329_v5  ;;  %v338_v13 = vpack.c.bf16 %v150_v10, %v149_v9  ;;  %v60_v16 = vld [vmem:[#allocation2] sm:$0xff]  ;;  %v341_v17 = vpack.c.bf16 %v152_v15, %v151_v14  ;;  %v153_v18 = vld [vmem:[#allocation7 + $0x30] sm:$0xff]  ;;  %v155_v21 = vld [vmem:[#allocation7 + $0x40] sm:$0xff]  ;;  %p436_p10 = scmp.ne.s32.totalorder %s248_s8, %s435_s9  ;;  %p441_p12 = scmp.lt.s32.totalorder %s435_s9, %s435_s9 }
  0x3b   :  { %331 = vmatprep.subr.bf16.mxu0 %v468_v0  ;;  %336 = vmatpush3.bf16.msra.mxu1 %v335_v12  ;;  %v154_v19 = vld [vmem:[#allocation7 + $0x38] sm:$0xff]  ;;  %v156_v22 = vld [vmem:[#allocation7 + $0x48] sm:$0xff]  ;;  %v157_v24 = vld [vmem:[#allocation7 + $0x50] sm:$0xff] }
  0x3c   :  { %337 = vmatprep.subr.bf16.mxu1 %v468_v0  ;;  %v344_v20 = vpack.c.bf16 %v154_v19, %v153_v18  ;;  %v347_v23 = vpack.c.bf16 %v156_v22, %v155_v21  ;;  %v158_v25 = vld [vmem:[#allocation7 + $0x58] sm:$0xff]  ;;  %v159_v27 = vld [vmem:[#allocation7 + $0x60] sm:$0xff]  ;;  %v160_v28 = vld [vmem:[#allocation7 + $0x68] sm:$0xff]  ;;  %p442_p13 = por %p441_p12, %p440_p11 }
  0x3d   :  { %v350_v26 = vpack.c.bf16 %v158_v25, %v157_v24  ;;  %v353_v29 = vpack.c.bf16 %v160_v28, %v159_v27  ;;  %v161_v30 = vld [vmem:[#allocation7 + $0x70] sm:$0xff]  ;;  %v162_v31 = vld [vmem:[#allocation7 + $0x78] sm:$0xff] }
  0x3e   :  { %333 = vmatpush3.bf16.msra.mxu0 %v332_v11  ;;  %v356_v32 = vpack.c.bf16 %v162_v31, %v161_v30  ;;  %v257_v33 = vld [vmem:[%s564_s2] ss:$0 sm:$0xff]  ;;  %p443_p0 = pnand %p442_p13, %p436_p10 }
  0x3f   :  { %339 = vmatpush3.bf16.msra.mxu1 %v338_v13  ;;  %v259_v38 = vld [vmem:[%s566_s4] ss:$0 sm:$0xff] }
  0x40   :  { %340 = vmatprep.subr.bf16.mxu1 %v468_v0 }
  0x41   :  { %291 = vmatmul.mubr.msk.f32.vlgmr.msra.gmra.mrb[0].mxu0 %vm72_vm1, %v60_v16 }
  0x43   :  { %342 = vmatpush3.bf16.msra.mxu1 %v341_v17 }
  0x44   :  { %343 = vmatprep.subr.bf16.mxu1 %v468_v0 }
  0x47   :  { %345 = vmatpush3.bf16.msra.mxu1 %v344_v20 }
  0x48   :  { %346 = vmatprep.subr.bf16.mxu1 %v468_v0 }
  0x4b   :  { %348 = vmatpush3.bf16.msra.mxu1 %v347_v23 }
  0x4c   :  { %349 = vmatprep.subr.bf16.mxu1 %v468_v0 }
  0x4f   :  { %351 = vmatpush3.bf16.msra.mxu1 %v350_v26 }
  0x50   :  { %352 = vmatprep.subr.bf16.mxu1 %v468_v0 }
  0x53   :  { %354 = vmatpush3.bf16.msra.mxu1 %v353_v29 }
  0x54   :  { %355 = vmatprep.subr.bf16.mxu1 %v468_v0 }
  0x57   :  { %357 = vmatpush3.bf16.msra.mxu1 %v356_v32 }
 0x114   :  { %v142_v34 = vpop.f32.mrb[0].mxu0 }
 0x115   :  { %v143_v35 = vadd.f32 %v257_v33, %v142_v34  ;;  %v292_v36 = vpop.f32.mrb[1].mxu0 }
 0x117   :  { %367 = vtanh.f32 %v143_v35 }
 0x121   :  { %v368_v37 = vpop.eup %367 }
 0x122   :  { %326 = vmatmul.mubr.f32.vlgmr.msra.gmra.mrb[0].mxu1 %v368_v37 }
 0x1f5   :  { %v236_v39 = vpop.f32.mrb[0].mxu1 }
 0x1f6   :  { %v237_v40 = vadd.f32 %v259_v38, %v236_v39  ;;  %v327_v41 = vpop.f32.mrb[1].mxu1 }
 0x1f8   :  { %240 = vst [vmem:[#allocation8] sm:$0xff] %v237_v40 }
 0x1f9   :  { %446 = shalt.err (!%p443_p0)
}
 0x1fa   :  { %s447_s11 = scalar_lea.hbm %s567_s5, 128 }
 0x1fb   :  { %p448_p1 = scmp.ne.s32.totalorder %s567_s5, %s447_s11  ;;  %p451_p2 = scmp.lt.u32.totalorder %s447_s11, %s567_s5 }
 0x1fd   :  { %p453_p3 = pnand %p451_p2, %p448_p1 }
 0x1ff   :  { %456 = shalt.err (!%p453_p3)
}
 0x200   :  { %250 = dma.vmem_to_hbm [thread:$0]  %s248_s8, 128, %s567_s5, [#allocation4]  }
 0x201   :  { %461 = dma.done.wait [#allocation4], 128  }
 0x202   :  { %462 = vsyncadd [#allocation4], 4294967168 }
 0x203   :  { %254 = vsyncpa [#allocation3], 1 }
 0x204   :  { %255 = vsyncpa [#allocation6], 1 }
 0x205   :  { %256 = vsyncpa [#allocation4], 1 }

</bundles_post_ra>
